<compile_context>
chip_gen: v5e
topology: v5e:2x2
jax: 0.10.0
libtpu: 0.0.40
codegen_flags: <defaults>
</compile_context>

<pallas_src>
import functools

import jax
import jax.numpy as jnp
from jax import lax
from jax.experimental import pallas as pl
from jax.experimental.pallas import tpu as pltpu


# -----------------------------------------------------------------------------
# Kernel (batch tile kept in (TB, D); feature-major intermediates (·, TB))
#   z        : (TB, D)       state tile
#   w_in,b_in: (H+Hf, D), (H+Hf, 1)   stacked first layers [W1 ; Wf1]
#   w2, b2   : (H, H), (H, 1)         H-net layer 2
#   w2st     : (H, H)                 W2^T * w3        (backward, w3 folded)
#   w_last_t : (H+Hf, D)              [W1symT | Wf2]^T (backward, J folded, F fused)
#   b_out    : (1, D)                 bf2
#   out      : (TB, D)                J gradH + F(z)
# -----------------------------------------------------------------------------
def _ghd_kernel(z_ref, w_in_ref, b_in_ref, w2_ref, b2_ref, w2st_ref,
                w_last_t_ref, b_out_ref, out_ref, *, hidden):
    cdt = w_in_ref.dtype                                  # matmul operand dtype
    z = z_ref[...].astype(cdt)                            # (TB, D)

    # Stacked first layers of H-net and F-net: contract the feature axis of z
    # directly (q@k^T-style dimension numbers) -> no materialized transpose.
    pre = lax.dot_general(w_in_ref[...], z, (((1,), (1,)), ((), ())),
                          preferred_element_type=jnp.float32)      # (H+Hf, TB)
    act = jnp.tanh(pre + b_in_ref[...])                            # f32
    a1 = act[:hidden, :]                                  # (H,  TB)  H-net L1
    af = act[hidden:, :]                                  # (Hf, TB)  F-net L1

    # H-net layer 2 (forward)
    a2 = jnp.tanh(jnp.dot(w2_ref[...], a1.astype(cdt),
                          preferred_element_type=jnp.float32) + b2_ref[...])

    # Analytic dH/dz backward sweep; w3 folded into w2st.
    g2 = 1.0 - a2 * a2                                    # (H, TB)
    s1 = (1.0 - a1 * a1) * jnp.dot(w2st_ref[...], g2.astype(cdt),
                                   preferred_element_type=jnp.float32)  # (H, TB)

    # Fused output matmul: out = [W1symT | Wf2] @ [s1 ; af] + bf2, produced
    # directly in (TB, D) via dv-style dimension numbers (contract dim 0 / dim 0).
    s_fused = jnp.concatenate([s1, af], axis=0).astype(cdt)          # (H+Hf, TB)
    out = lax.dot_general(s_fused, w_last_t_ref[...], (((0,), (0,)), ((), ())),
                          preferred_element_type=jnp.float32)        # (TB, D)
    out_ref[...] = (out + b_out_ref[...]).astype(out_ref.dtype)


def generalized_hamiltonian_dynamics(z, w1, b1, w2, b2, w3, wf1, bf1, wf2, bf2,
                                     *, tb=None, matmul_dtype=None):
    """out = J * dH/dz + F(z), with H/F the tanh MLPs of the PyTorch module.

    matmul_dtype: dtype of MXU operands (f32 default; jnp.bfloat16 recommended
    on v6e/v7x, keeps f32 accumulation and f32 elementwise math).
    """
    B, D = z.shape
    H = w1.shape[0]
    Hf = wf1.shape[0]
    assert D % 2 == 0, "phase space dim must be even (z = [q, p])"
    dim = D // 2
    if matmul_dtype is None:
        matmul_dtype = z.dtype
    f32 = jnp.float32

    # ---- trace-time weight folding (tiny; hoisted/constant-folded by XLA) ----
    w_in = jnp.concatenate([w1, wf1], axis=0).astype(matmul_dtype)          # (H+Hf, D)
    b_in = jnp.concatenate([b1, bf1], axis=0).reshape(H + Hf, 1).astype(f32)
    w2st = (w2.T * w3.reshape(1, H)).astype(matmul_dtype)                   # (H, H)
    w1symt = jnp.concatenate([w1[:, dim:].T, -w1[:, :dim].T], axis=0)       # (D, H)
    w_last_t = jnp.concatenate([w1symt, wf2], axis=1).T.astype(matmul_dtype)  # (H+Hf, D)
    w2m = w2.astype(matmul_dtype)
    b2c = b2.reshape(H, 1).astype(f32)
    b_out = bf2.reshape(1, D).astype(f32)

    # ---- batch tiling: pad to a lane multiple, prefer >=2 grid steps (v7x) ----
    if tb is None:
        if B < 128:
            tb, b_pad = B, B                       # single full-array block
        else:
            b_pad = ((B + 127) // 128) * 128
            tb = next((c for c in (2048, 1024, 512, 256, 128)
                       if b_pad % c == 0 and b_pad // c >= 2), 128)
    else:
        b_pad = ((B + tb - 1) // tb) * tb
    z_in = z if b_pad == B else jnp.pad(z, ((0, b_pad - B), (0, 0)))
    grid = (b_pad // tb,)

    # per-step footprint: double-buffered (lane-padded) z/out tiles + (H+Hf, TB) intermediates
    vmem_limit = int(min(max(tb * 6144 + (4 << 20), 16 << 20), 64 << 20))

    def resident(shape):
        # weight/bias blocks: full array, same block every step -> VMEM-resident
        return pl.BlockSpec(shape, lambda i: (0,) * len(shape))

    out_pad = pl.pallas_call(
        functools.partial(_ghd_kernel, hidden=H),
        out_shape=jax.ShapeDtypeStruct((b_pad, D), z.dtype),
        grid_spec=pltpu.PrefetchScalarGridSpec(
            num_scalar_prefetch=0,
            grid=grid,
            in_specs=[
                pl.BlockSpec((tb, D), lambda i: (i, 0)),     # z tile (no wrapper transpose)
                resident((H + Hf, D)), resident((H + Hf, 1)),  # stacked W_in, b_in
                resident((H, H)), resident((H, 1)),            # W2, b2
                resident((H, H)),                              # W2^T * w3
                resident((H + Hf, D)),                         # [W1symT | Wf2]^T
                resident((1, D)),                              # bf2 row
            ],
            out_specs=pl.BlockSpec((tb, D), lambda i: (i, 0)),
        ),
        compiler_params=pltpu.CompilerParams(
            dimension_semantics=("parallel",),                 # shard batch over TCs (v7x)
            vmem_limit_bytes=vmem_limit),
    )(z_in, w_in, b_in, w2m, b2c, w2st, w_last_t, b_out)

    return out_pad if b_pad == B else out_pad[:B]


# ---------------- pure-JAX reference (jax.grad mirrors autograd.grad) --------
def generalized_hamiltonian_dynamics_ref(z, w1, b1, w2, b2, w3, b3,
                                         wf1, bf1, wf2, bf2):
    def H_sum(s):
        a1 = jnp.tanh(s @ w1.T + b1)
        a2 = jnp.tanh(a1 @ w2.T + b2)
        return (a2 @ w3.T + b3).sum()

    gradH = jax.grad(H_sum)(z)
    dim = z.shape[1] // 2
    hnn = jnp.concatenate([gradH[:, dim:], -gradH[:, :dim]], axis=-1)
    forcing = jnp.tanh(z @ wf1.T + bf1) @ wf2.T + bf2
    return hnn + forcing


if __name__ == "__main__":
    key = jax.random.PRNGKey(0)
    keys = jax.random.split(key, 11)

    input_dim = 16   # phase space: q dim 8, p dim 8
    hidden = 32      # hidden width of both H-net and F-net

    # HamiltonianNet: Linear(D,H) -> Tanh -> Linear(H,H) -> Tanh -> Linear(H,1)
    w1 = jax.random.normal(keys[1], (hidden, input_dim), jnp.float32) * 0.2
    b1 = jax.random.normal(keys[2], (hidden,), jnp.float32) * 0.1
    w2 = jax.random.normal(keys[3], (hidden, hidden), jnp.float32) * 0.2
    b2 = jax.random.normal(keys[4], (hidden,), jnp.float32) * 0.1
    w3 = jax.random.normal(keys[5], (1, hidden), jnp.float32) * 0.2
    b3 = jax.random.normal(keys[6], (1,), jnp.float32) * 0.1   # no effect on gradH
    # ForcingNet: Linear(D,H) -> Tanh -> Linear(H,D)
    wf1 = jax.random.normal(keys[7], (hidden, input_dim), jnp.float32) * 0.2
    bf1 = jax.random.normal(keys[8], (hidden,), jnp.float32) * 0.1
    wf2 = jax.random.normal(keys[9], (input_dim, hidden), jnp.float32) * 0.2
    bf2 = jax.random.normal(keys[10], (input_dim,), jnp.float32) * 0.1
    params = (w1, b1, w2, b2, w3, wf1, bf1, wf2, bf2)

    def check(batch, matmul_dtype, atol, rtol, seed):
        zb = jax.random.normal(jax.random.PRNGKey(seed), (batch, input_dim), jnp.float32)
        out = generalized_hamiltonian_dynamics(zb, *params, matmul_dtype=matmul_dtype)
        out = jax.block_until_ready(out)
        with jax.default_matmul_precision("highest"):
            ref = generalized_hamiltonian_dynamics_ref(zb, w1, b1, w2, b2, w3, b3,
                                                       wf1, bf1, wf2, bf2)
        ref = jax.block_until_ready(ref)
        assert out.shape == (batch, input_dim)
        assert jnp.allclose(out, ref, atol=atol, rtol=rtol), (
            f"mismatch vs jax.grad reference (batch={batch}, dtype={matmul_dtype})")

    # small batch: single full-array block, f32 matmuls, tight tolerance
    check(8, jnp.float32, 2e-5, 2e-5, seed=0)
    # tiled path: B=256 -> tb=128, 2 grid steps ("parallel" batch axis), f32
    check(256, jnp.float32, 2e-5, 2e-5, seed=1)
    # bf16 matmul operands with f32 accumulation (the v6e/v7x fast path)
    check(8, jnp.bfloat16, 3e-2, 3e-2, seed=2)

    print("KERNEL_OK")
</pallas_src>

<mosaic_0001>
module attributes {stable_mosaic.version = 11 : i64} {
  func.func @_ghd_kernel(%arg0: i32, %arg1: memref<8x16xf32, #tpu.memory_space<vmem>>, %arg2: memref<64x16xf32, #tpu.memory_space<vmem>>, %arg3: memref<64x1xf32, #tpu.memory_space<vmem>>, %arg4: memref<32x32xf32, #tpu.memory_space<vmem>>, %arg5: memref<32x1xf32, #tpu.memory_space<vmem>>, %arg6: memref<32x32xf32, #tpu.memory_space<vmem>>, %arg7: memref<64x16xf32, #tpu.memory_space<vmem>>, %arg8: memref<1x16xf32, #tpu.memory_space<vmem>>, %arg9: memref<8x16xf32, #tpu.memory_space<vmem>>) attributes {dimension_semantics = [#tpu.dimension_semantics<parallel>], iteration_bounds = array<i64: 1>, scalar_prefetch = 0 : i64, scratch_operands = 0 : i64, tpu.core_type = #tpu.core_type<tc>, window_params = [{transform_indices = @transform_0, window_bounds = array<i64: 8, 16>}, {pipeline_mode = #tpu.pipeline_mode<synchronous>, transform_indices = @transform_1, window_bounds = array<i64: 64, 16>}, {pipeline_mode = #tpu.pipeline_mode<synchronous>, transform_indices = @transform_2, window_bounds = array<i64: 64, 1>}, {pipeline_mode = #tpu.pipeline_mode<synchronous>, transform_indices = @transform_3, window_bounds = array<i64: 32, 32>}, {pipeline_mode = #tpu.pipeline_mode<synchronous>, transform_indices = @transform_4, window_bounds = array<i64: 32, 1>}, {pipeline_mode = #tpu.pipeline_mode<synchronous>, transform_indices = @transform_5, window_bounds = array<i64: 32, 32>}, {pipeline_mode = #tpu.pipeline_mode<synchronous>, transform_indices = @transform_6, window_bounds = array<i64: 64, 16>}, {pipeline_mode = #tpu.pipeline_mode<synchronous>, transform_indices = @transform_7, window_bounds = array<i64: 1, 16>}, {transform_indices = @transform_8, window_bounds = array<i64: 8, 16>}]} {
    %c0 = arith.constant 0 : index
    %c0_0 = arith.constant 0 : index
    %0 = vector.load %arg1[%c0, %c0_0] : memref<8x16xf32, #tpu.memory_space<vmem>>, vector<8x16xf32>
    %c0_1 = arith.constant 0 : index
    %c0_2 = arith.constant 0 : index
    %1 = vector.load %arg2[%c0_1, %c0_2] : memref<64x16xf32, #tpu.memory_space<vmem>>, vector<64x16xf32>
    %cst = arith.constant dense<0.000000e+00> : vector<64x8xf32>
    %2 = tpu.matmul %1, %0, %cst {dimension_numbers = #tpu.dot_dimension_numbers<[1], [1], [0], [0], [0, 0, 1, 0], [], []>} : vector<64x16xf32>, vector<8x16xf32>, vector<64x8xf32> -> vector<64x8xf32>
    %c0_3 = arith.constant 0 : index
    %c0_4 = arith.constant 0 : index
    %3 = vector.load %arg3[%c0_3, %c0_4] : memref<64x1xf32, #tpu.memory_space<vmem>>, vector<64x1xf32>
    %4 = vector.broadcast %3 : vector<64x1xf32> to vector<64x8xf32>
    %5 = arith.addf %2, %4 : vector<64x8xf32>
    %6 = math.tanh %5 : vector<64x8xf32>
    %7 = vector.extract_strided_slice %6 {offsets = [0, 0], sizes = [32, 8], strides = [1, 1]} : vector<64x8xf32> to vector<32x8xf32>
    %8 = vector.extract_strided_slice %6 {offsets = [32, 0], sizes = [32, 8], strides = [1, 1]} : vector<64x8xf32> to vector<32x8xf32>
    %c0_5 = arith.constant 0 : index
    %c0_6 = arith.constant 0 : index
    %9 = vector.load %arg4[%c0_5, %c0_6] : memref<32x32xf32, #tpu.memory_space<vmem>>, vector<32x32xf32>
    %cst_7 = arith.constant dense<0.000000e+00> : vector<32x8xf32>
    %10 = tpu.matmul %9, %7, %cst_7 {dimension_numbers = #tpu.dot_dimension_numbers<[1], [0], [0], [1], [0, 0, 1, 1], [], []>} : vector<32x32xf32>, vector<32x8xf32>, vector<32x8xf32> -> vector<32x8xf32>
    %c0_8 = arith.constant 0 : index
    %c0_9 = arith.constant 0 : index
    %11 = vector.load %arg5[%c0_8, %c0_9] : memref<32x1xf32, #tpu.memory_space<vmem>>, vector<32x1xf32>
    %12 = vector.broadcast %11 : vector<32x1xf32> to vector<32x8xf32>
    %13 = arith.addf %10, %12 : vector<32x8xf32>
    %14 = math.tanh %13 : vector<32x8xf32>
    %15 = arith.mulf %14, %14 : vector<32x8xf32>
    %cst_10 = arith.constant 1.000000e+00 : f32
    %16 = vector.broadcast %cst_10 : f32 to vector<32x8xf32>
    %17 = arith.subf %16, %15 : vector<32x8xf32>
    %18 = arith.mulf %7, %7 : vector<32x8xf32>
    %cst_11 = arith.constant 1.000000e+00 : f32
    %19 = vector.broadcast %cst_11 : f32 to vector<32x8xf32>
    %20 = arith.subf %19, %18 : vector<32x8xf32>
    %c0_12 = arith.constant 0 : index
    %c0_13 = arith.constant 0 : index
    %21 = vector.load %arg6[%c0_12, %c0_13] : memref<32x32xf32, #tpu.memory_space<vmem>>, vector<32x32xf32>
    %cst_14 = arith.constant dense<0.000000e+00> : vector<32x8xf32>
    %22 = tpu.matmul %21, %17, %cst_14 {dimension_numbers = #tpu.dot_dimension_numbers<[1], [0], [0], [1], [0, 0, 1, 1], [], []>} : vector<32x32xf32>, vector<32x8xf32>, vector<32x8xf32> -> vector<32x8xf32>
    %23 = arith.mulf %20, %22 : vector<32x8xf32>
    %24 = tpu.concatenate %23, %8 in 0 : vector<32x8xf32>, vector<32x8xf32> -> vector<64x8xf32>
    %c0_15 = arith.constant 0 : index
    %c0_16 = arith.constant 0 : index
    %25 = vector.load %arg7[%c0_15, %c0_16] : memref<64x16xf32, #tpu.memory_space<vmem>>, vector<64x16xf32>
    %cst_17 = arith.constant dense<0.000000e+00> : vector<8x16xf32>
    %26 = tpu.matmul %24, %25, %cst_17 {dimension_numbers = #tpu.dot_dimension_numbers<[0], [0], [1], [1], [0, 1, 1, 1], [], []>} : vector<64x8xf32>, vector<64x16xf32>, vector<8x16xf32> -> vector<8x16xf32>
    %c0_18 = arith.constant 0 : index
    %c0_19 = arith.constant 0 : index
    %27 = vector.load %arg8[%c0_18, %c0_19] : memref<1x16xf32, #tpu.memory_space<vmem>>, vector<1x16xf32>
    %28 = vector.broadcast %27 : vector<1x16xf32> to vector<8x16xf32>
    %29 = arith.addf %26, %28 : vector<8x16xf32>
    %c0_20 = arith.constant 0 : index
    %c0_21 = arith.constant 0 : index
    %30 = vector.load %arg9[%c0_20, %c0_21] : memref<8x16xf32, #tpu.memory_space<vmem>>, vector<8x16xf32>
    tpu.vector_store %arg9[%c0_20, %c0_21], %29 {strides = array<i32>} : memref<8x16xf32, #tpu.memory_space<vmem>>, vector<8x16xf32>,
    return
  }
  func.func @transform_0(%arg0: i32) -> (i32, i32) {
    %c0_i32 = arith.constant 0 : i32
    %c0_i32_0 = arith.constant 0 : i32
    return %arg0, %c0_i32 : i32, i32
  }
  func.func @transform_1(%arg0: i32) -> (i32, i32) {
    %c0_i32 = arith.constant 0 : i32
    %c0_i32_0 = arith.constant 0 : i32
    %c0_i32_1 = arith.constant 0 : i32
    return %c0_i32, %c0_i32_0 : i32, i32
  }
  func.func @transform_2(%arg0: i32) -> (i32, i32) {
    %c0_i32 = arith.constant 0 : i32
    %c0_i32_0 = arith.constant 0 : i32
    %c0_i32_1 = arith.constant 0 : i32
    return %c0_i32, %c0_i32_0 : i32, i32
  }
  func.func @transform_3(%arg0: i32) -> (i32, i32) {
    %c0_i32 = arith.constant 0 : i32
    %c0_i32_0 = arith.constant 0 : i32
    %c0_i32_1 = arith.constant 0 : i32
    return %c0_i32, %c0_i32_0 : i32, i32
  }
  func.func @transform_4(%arg0: i32) -> (i32, i32) {
    %c0_i32 = arith.constant 0 : i32
    %c0_i32_0 = arith.constant 0 : i32
    %c0_i32_1 = arith.constant 0 : i32
    return %c0_i32, %c0_i32_0 : i32, i32
  }
  func.func @transform_5(%arg0: i32) -> (i32, i32) {
    %c0_i32 = arith.constant 0 : i32
    %c0_i32_0 = arith.constant 0 : i32
    %c0_i32_1 = arith.constant 0 : i32
    return %c0_i32, %c0_i32_0 : i32, i32
  }
  func.func @transform_6(%arg0: i32) -> (i32, i32) {
    %c0_i32 = arith.constant 0 : i32
    %c0_i32_0 = arith.constant 0 : i32
    %c0_i32_1 = arith.constant 0 : i32
    return %c0_i32, %c0_i32_0 : i32, i32
  }
  func.func @transform_7(%arg0: i32) -> (i32, i32) {
    %c0_i32 = arith.constant 0 : i32
    %c0_i32_0 = arith.constant 0 : i32
    %c0_i32_1 = arith.constant 0 : i32
    return %c0_i32, %c0_i32_0 : i32, i32
  }
  func.func @transform_8(%arg0: i32) -> (i32, i32) {
    %c0_i32 = arith.constant 0 : i32
    %c0_i32_0 = arith.constant 0 : i32
    return %arg0, %c0_i32 : i32, i32
  }
}

</mosaic_0001>

<bundles_post_ra>
// kernel: tpu_custom_call.1
= control target key start
LH: loop header
LB: loop body
LE: loop exit
PB: predicated region body
PF: predicated region fallthrough
CT: control target
= control target key end

     0   :  { %vm87_vm0 = vcmask 130048   ;;  %v464_v3 = vmov 0   ;;  %s662_s0 = inlined_call_operand.vmem [shape: f32[8,16], index: 0, kind: input, shape index: {}]   ;;  %s663_s1 = inlined_call_operand.vmem [shape: f32[64,16], index: 1, kind: input, shape index: {}]   ;;  %s664_s2 = inlined_call_operand.vmem [shape: f32[64,1], index: 2, kind: input, shape index: {}]   ;;  %s665_s3 = inlined_call_operand.vmem [shape: f32[32,32], index: 3, kind: input, shape index: {}]   ;;  %s666_s4 = inlined_call_operand.vmem [shape: f32[32,1], index: 4, kind: input, shape index: {}]   ;;  %s667_s5 = inlined_call_operand.vmem [shape: f32[32,32], index: 5, kind: input, shape index: {}]   ;;  %s668_s6 = inlined_call_operand.vmem [shape: f32[64,16], index: 6, kind: input, shape index: {}]   ;;  %s669_s7 = inlined_call_operand.vmem [shape: f32[1,16], index: 7, kind: input, shape index: {}]   ;;  %s670_s8 = inlined_call_operand.hbm [shape: f32[8,16], index: 8, kind: output, shape index: {}]  }
   0x1   :  { %v30_v0 = vld [vmem:[%s662_s0] sm:$0xff]  ;;  %v40_v1 = vld [vmem:[%s664_s2 + $0x8] sm:$0xff]  ;;  %411 = vset.pattern.permute.xlu1 %v464_v3  ;;  %v42_v4 = vld [vmem:[%s664_s2 + $0x18] sm:$0xff]  ;;  %410 = vset.pattern.permute.xlu0 %v464_v3 }
   0x2   :  { %388 = vmatpush.xpose.msk.msra.mxu0 %vm87_vm0, %v30_v0  ;;  %v31_v2 = vld [vmem:[%s663_s1] sm:$0xff]  ;;  %54 = vperm.xlu1 %411, %v40_v1   ;;  %v36_v5 = vld [vmem:[%s663_s1 + $0x28] sm:$0xff] }
   0x3   :  { %64 = vperm.xlu0 %410, %v42_v4   ;;  %406 = vmatpush.xpose.msk.msra.mxu3 %vm87_vm0, %v30_v0 }
   0x4   :  { %412 = vset.pattern.permute.xlu2 %v464_v3 }
   0x5   :  { %389 = vmatmul.msk.f32.vlgmr.msra.gmra.mxu0 %vm87_vm0, %v31_v2 }
   0x6   :  { %13 = vsyncpa [#allocation3], 0  ;;  %394 = vmatmul.msk.f32.vlgmr.msra.gmra.mxu3 %vm87_vm0, %v36_v5  ;;  %v39_v6 = vld [vmem:[%s664_s2] sm:$0xff]  ;;  %v41_v7 = vld [vmem:[%s664_s2 + $0x10] sm:$0xff]  ;;  %vm192_vm1 = vcmask 261120   ;;  %vm347_vm2 = vcmask 523264  }
   0x7   :  { %v32_v8 = vld [vmem:[%s663_s1 + $0x8] sm:$0xff]  ;;  %v37_v9 = vld [vmem:[%s663_s1 + $0x30] sm:$0xff]  ;;  %v168_v10 = vld [vmem:[%s666_s4] sm:$0xff] }
   0x8   :  { %v169_v11 = vld [vmem:[%s666_s4 + $0x8] sm:$0xff]  ;;  %v33_v12 = vld [vmem:[%s663_s1 + $0x10] sm:$0xff]  ;;  %v34_v15 = vld [vmem:[%s663_s1 + $0x18] sm:$0xff] }
   0x9   :  { %v45_v13 = vld [vmem:[%s664_s2 + $0x30] sm:$0xff]  ;;  %v44_v14 = vld [vmem:[%s664_s2 + $0x28] sm:$0xff]  ;;  %v38_v21 = vld [vmem:[%s663_s1 + $0x38] sm:$0xff] }
   0xa   :  { %49 = vperm.xlu1 %411, %v39_v6   ;;  %v35_v26 = vld [vmem:[%s663_s1 + $0x20] sm:$0xff]  ;;  %v171_v31 = vld [vmem:[%s666_s4 + $0x18] sm:$0xff]  ;;  %v170_v36 = vld [vmem:[%s666_s4 + $0x10] sm:$0xff] }
   0xb   :  { %59 = vperm.xlu0 %410, %v41_v7   ;;  %189 = vperm.xlu2 %412, %v171_v31   ;;  %v164_v34 = vld [vmem:[%s665_s3] sm:$0xff]  ;;  %v165_v37 = vld [vmem:[%s665_s3 + $0x8] sm:$0xff]  ;;  %v166_v39 = vld [vmem:[%s665_s3 + $0x10] sm:$0xff] }
   0xc   :  { %v43_v38 = vld [vmem:[%s664_s2 + $0x20] sm:$0xff]  ;;  %v46_v40 = vld [vmem:[%s664_s2 + $0x38] sm:$0xff]  ;;  %v255_v3 = vld [vmem:[%s667_s5 + $0x8] sm:$0xff] }
   0xd   :  { %390 = vmatmul.msk.f32.gmra.mxu0 %vm87_vm0, %v32_v8  ;;  %v167_v41 = vld [vmem:[%s665_s3 + $0x18] sm:$0xff]  ;;  %v254_v2 = vld [vmem:[%s667_s5] sm:$0xff]  ;;  %v256_v4 = vld [vmem:[%s667_s5 + $0x10] sm:$0xff]  ;;  %s379_s3 = sshll.u32 %s670_s8, 4  ;;  %s380_s3 = int_to_ptr.hbm [resolvable:$true] %s379_s3 }
   0xe   :  { %395 = vmatmul.msk.f32.gmra.mxu3 %vm87_vm0, %v37_v9  ;;  %v257_v5 = vld [vmem:[%s667_s5 + $0x18] sm:$0xff] }
  0x12   :  { %174 = vperm.xlu1 %411, %v168_v10  }
  0x13   :  { %179 = vperm.xlu0 %410, %v169_v11   ;;  %184 = vperm.xlu2 %412, %v170_v36  }
  0x15   :  { %391 = vmatmul.msk.f32.gmra.mxu0 %vm87_vm0, %v33_v12 }
  0x16   :  { %396 = vmatmul.msk.f32.gmra.mxu3 %vm87_vm0, %v38_v21 }
  0x1a   :  { %79 = vperm.xlu1 %411, %v45_v13  }
  0x1b   :  { %74 = vperm.xlu0 %410, %v44_v14   ;;  %69 = vperm.xlu2 %412, %v43_v38   ;;  %v303_v38 = vld [vmem:[%s668_s6] sm:$0xff] }
  0x1d   :  { %392 = vmatmul.msk.f32.gmra.mxu0 %vm87_vm0, %v34_v15 }
  0x23   :  { %84 = vperm.xlu2 %412, %v46_v40  }
  0x25   :  { %393 = vmatmul.msk.f32.gmra.mxu0 %vm87_vm0, %v35_v26  ;;  %v310_v26 = vld [vmem:[%s668_s6 + $0x38] sm:$0xff] }
  0x26   :  { %359 = vmatpush.msrb.mxu3 %v310_v26 }
  0x65   :  { %v190_v44 = vpop.permute.xlu2 %189 }
  0x6d   :  { %v185_v46 = vpop.permute.xlu2 %184 }
  0x74   :  { %v55_v19 = vpop.permute.xlu1 %54 }
  0x75   :  { %v65_v18 = vpop.permute.xlu0 %64 }
  0x7c   :  { %v50_v27 = vpop.permute.xlu1 %49 }
  0x7d   :  { %v60_v22 = vpop.permute.xlu0 %59 }
  0x82   :  { %v132_v16 = vpop.f32.mrf.mxu0 }
  0x83   :  { %v133_v29 = vadd.f32 %v132_v16, %v50_v27  ;;  %v309_v27 = vld [vmem:[%s668_s6 + $0x30] sm:$0xff] }
  0x84   :  { %v175_v50 = vpop.permute.xlu1 %174  ;;  %360 = vmatpush.msrb.mxu3 %v309_v27 }
  0x85   :  { %v180_v47 = vpop.permute.xlu0 %179 }
  0x8a   :  { %v135_v17 = vpop.f32.mrf.mxu0 }
  0x8b   :  { %v136_v28 = vadd.f32 %v135_v17, %v55_v19 }
  0x92   :  { %v138_v20 = vpop.f32.mrf.mxu0 }
  0x93   :  { %v139_v24 = vadd.f32 %v138_v20, %v60_v22  ;;  %v70_v20 = vpop.permute.xlu2 %69 }
  0x9a   :  { %v141_v23 = vpop.f32.mrf.mxu0 }
  0x9b   :  { %v142_v25 = vadd.f32 %v141_v23, %v65_v18 }
  0x9d   :  { %414 = vtanh.f32 %v142_v25  ;;  %v147_v25 = vpop.f32.mrf.mxu3 }
  0x9e   :  { %416 = vtanh.f32 %v139_v24 }
  0x9f   :  { %418 = vtanh.f32 %v136_v28  ;;  %v75_v28 = vpop.permute.xlu0 %74 }
  0xa0   :  { %420 = vtanh.f32 %v133_v29  ;;  %v308_v29 = vld [vmem:[%s668_s6 + $0x28] sm:$0xff]  ;;  %v148_v31 = vadd.f32 %v147_v25, %v75_v28 }
  0xa1   :  { %361 = vmatpush.msrb.mxu3 %v308_v29 }
  0xa2   :  { %v144_v19 = vpop.f32.mrf.mxu0 }
  0xa3   :  { %v572_v30 = vpop.eup %414  ;;  %v145_v22 = vadd.f32 %v144_v19, %v70_v20 }
  0xa4   :  { %217 = vmatpush.msra.mxu1 %v572_v30  ;;  %v578_v32 = vpop.eup %416  ;;  %v249_v18 = vmul.f32 %v572_v30, %v572_v30  ;;  %v307_v30 = vld [vmem:[%s668_s6 + $0x20] sm:$0xff] }
  0xa5   :  { %v581_v33 = vpop.eup %418  ;;  %v248_v14 = vmul.f32 %v578_v32, %v578_v32  ;;  %362 = vmatpush.msrb.mxu3 %v307_v30  ;;  %v150_v36 = vpop.f32.mrf.mxu3 }
  0xa6   :  { %218 = vmatpush.msra.mxu1 %v578_v32  ;;  %v421_v35 = vpop.eup %420  ;;  %v247_v10 = vmul.f32 %v581_v33, %v581_v33  ;;  %v253_v21 = vsub.f32 1.0, %v249_v18  ;;  %v306_v32 = vld [vmem:[%s668_s6 + $0x18] sm:$0xff] }
  0xa7   :  { %v246_v6 = vmul.f32 %v421_v35, %v421_v35  ;;  %v252_v15 = vsub.f32 1.0, %v248_v14  ;;  %363 = vmatpush.msrb.mxu3 %v306_v32 }
  0xa8   :  { %219 = vmatpush.msra.mxu1 %v581_v33  ;;  %v251_v11 = vsub.f32 1.0, %v247_v10 }
  0xa9   :  { %v250_v7 = vsub.f32 1.0, %v246_v6 }
  0xaa   :  { %220 = vmatpush.msra.mxu1 %v421_v35  ;;  %v80_v35 = vpop.permute.xlu1 %79 }
  0xab   :  { %397 = vmatmul.msk.f32.vlgmr.msra.gmra.mxu1 %vm192_vm1, %v164_v34  ;;  %v305_v34 = vld [vmem:[%s668_s6 + $0x10] sm:$0xff] }
  0xac   :  { %364 = vmatpush.msrb.mxu3 %v305_v34 }
  0xb3   :  { %398 = vmatmul.msk.f32.gmra.mxu1 %vm192_vm1, %v165_v37  ;;  %v304_v37 = vld [vmem:[%s668_s6 + $0x8] sm:$0xff]  ;;  %s465_s6 = smov [#allocation2]  }
  0xb4   :  { %365 = vmatpush.msrb.mxu3 %v304_v37  ;;  %s377_s27 = sshll.u32 %s465_s6, 4  ;;  %s378_s27 = int_to_ptr.vmem [resolvable:$true] %s377_s27 }
  0xb6   :  { %366 = vmatpush.msrb.mxu3 %v303_v38 }
  0xbb   :  { %399 = vmatmul.msk.f32.gmra.mxu1 %vm192_vm1, %v166_v39  ;;  %v151_v39 = vadd.f32 %v150_v36, %v80_v35 }
  0xc3   :  { %400 = vmatmul.msk.f32.gmra.mxu1 %vm192_vm1, %v167_v41  ;;  %v85_v41 = vpop.permute.xlu2 %84 }
 0x128   :  { %v222_v42 = vpop.f32.mrf.mxu1 }
 0x129   :  { %v223_v52 = vadd.f32 %v222_v42, %v175_v50  ;;  %v153_v42 = vpop.f32.mrf.mxu3 }
 0x130   :  { %v225_v43 = vpop.f32.mrf.mxu1 }
 0x131   :  { %v226_v49 = vadd.f32 %v225_v43, %v180_v47  ;;  %v154_v43 = vadd.f32 %v153_v42, %v85_v41  ;;  %v413_v47 = vld [vmem:[%s669_s7] ss:$0 sm:$0xff] }
 0x138   :  { %v228_v45 = vpop.f32.mrf.mxu1 }
 0x139   :  { %v229_v48 = vadd.f32 %v228_v45, %v185_v46 }
 0x13b   :  { %422 = vtanh.f32 %v229_v48 }
 0x13c   :  { %424 = vtanh.f32 %v226_v49 }
 0x140   :  { %v231_v51 = vpop.f32.mrf.mxu1 }
 0x141   :  { %v232_v53 = vadd.f32 %v231_v51, %v190_v44  ;;  %v423_v54 = vpop.eup %422 }
 0x142   :  { %v425_v55 = vpop.eup %424  ;;  %v240_v58 = vmul.f32 %v423_v54, %v423_v54 }
 0x143   :  { %426 = vtanh.f32 %v232_v53  ;;  %v239_v61 = vmul.f32 %v425_v55, %v425_v55 }
 0x144   :  { %428 = vtanh.f32 %v223_v52  ;;  %v244_v62 = vsub.f32 1.0, %v240_v58 }
 0x145   :  { %v243_v0 = vsub.f32 1.0, %v239_v61  ;;  %430 = vtanh.f32 %v145_v22 }
 0x146   :  { %432 = vtanh.f32 %v148_v31 }
 0x147   :  { %434 = vtanh.f32 %v151_v39 }
 0x148   :  { %436 = vtanh.f32 %v154_v43 }
 0x149   :  { %v427_v56 = vpop.eup %426 }
 0x14a   :  { %v241_v57 = vmul.f32 %v427_v56, %v427_v56  ;;  %v429_v59 = vpop.eup %428 }
 0x14b   :  { %v238_v63 = vmul.f32 %v429_v59, %v429_v59  ;;  %v431_v33 = vpop.eup %430 }
 0x14c   :  { %v245_v60 = vsub.f32 1.0, %v241_v57  ;;  %v433_v40 = vpop.eup %432 }
 0x14d   :  { %v242_v1 = vsub.f32 1.0, %v238_v63  ;;  %v435_v44 = vpop.eup %434 }
 0x14e   :  { %282 = vmatpush.msra.mxu2 %v245_v60  ;;  %v437_v45 = vpop.eup %436 }
 0x150   :  { %283 = vmatpush.msra.mxu2 %v244_v62 }
 0x152   :  { %284 = vmatpush.msra.mxu2 %v243_v0 }
 0x154   :  { %285 = vmatpush.msra.mxu2 %v242_v1 }
 0x155   :  { %401 = vmatmul.msk.f32.vlgmr.msra.gmra.mxu2 %vm192_vm1, %v254_v2 }
 0x15d   :  { %402 = vmatmul.msk.f32.gmra.mxu2 %vm192_vm1, %v255_v3 }
 0x165   :  { %403 = vmatmul.msk.f32.gmra.mxu2 %vm192_vm1, %v256_v4 }
 0x16d   :  { %404 = vmatmul.msk.f32.gmra.mxu2 %vm192_vm1, %v257_v5 }
 0x1d8   :  { %v287_v8 = vpop.f32.mrf.mxu2 }
 0x1d9   :  { %v299_v9 = vmul.f32 %v287_v8, %v250_v7 }
 0x1db   :  { %315 = vxpose.xlu0.b32.start [1/8] (short) (narrow) %v299_v9, 8 }
 0x1e0   :  { %v290_v12 = vpop.f32.mrf.mxu2 }
 0x1e1   :  { %v300_v13 = vmul.f32 %v290_v12, %v251_v11 }
 0x1e3   :  { %316 = vxpose.xlu0.b32.cont [2/8] (short) (narrow) %v300_v13, 8 }
 0x1e8   :  { %v293_v16 = vpop.f32.mrf.mxu2 }
 0x1e9   :  { %v301_v17 = vmul.f32 %v293_v16, %v252_v15 }
 0x1eb   :  { %317 = vxpose.xlu0.b32.cont [3/8] (short) (narrow) %v301_v17, 8 }
 0x1f0   :  { %v296_v23 = vpop.f32.mrf.mxu2 }
 0x1f1   :  { %v302_v24 = vmul.f32 %v296_v23, %v253_v21 }
 0x1f3   :  { %318 = vxpose.xlu0.b32.cont [4/8] (short) (narrow) %v302_v24, 8 }
 0x1fb   :  { %319 = vxpose.xlu0.b32.cont [5/8] (short) (narrow) %v431_v33, 8 }
 0x203   :  { %320 = vxpose.xlu0.b32.cont [6/8] (short) (narrow) %v433_v40, 8 }
 0x20b   :  { %321 = vxpose.xlu0.b32.cont [7/8] (short) (narrow) %v435_v44, 8 }
 0x213   :  { %322 = vxpose.xlu0.b32.end [8/8] (short) (narrow) %v437_v45, 8 }
 0x27f   :  { %v331_v46 = vpop.trf.xlu0 }
 0x280   :  { %405 = vmatmul.msk.f32.vlgmr.msrb.gmra.mxu3 %vm347_vm2, %v331_v46 }
 0x303   :  { %v368_v48 = vpop.f32.mrf.mxu3 }
 0x304   :  { %v369_v49 = vadd.f32 %v413_v47, %v368_v48 }
 0x306   :  { %371 = vst.msk [vmem:[#allocation2] sm:$0xff] %vm87_vm0, %v369_v49 }
 0x307   :  { %382 = dma.vmem_to_hbm [thread:$0]  %s378_s27, 128, %s380_s3, [#allocation3]  }
 0x308   :  { %462 = dma.done.wait [#allocation3], 128  }
 0x309   :  { %463 = vsyncadd [#allocation3], 4294967168 }
 0x30a   :  { %387 = vsyncpa [#allocation3], 1 }

</bundles_post_ra>
